<compile_context>
chip_gen: v5e
topology: v5e:2x2
jax: 0.10.0
libtpu: 0.0.40
codegen_flags: <defaults>
</compile_context>

<pallas_src>
import functools

import jax
import jax.numpy as jnp
from jax.experimental import pallas as pl
from jax.experimental.pallas import tpu as pltpu

_LANE = 128
_MAX_VIEW_COLS = 4096

# Per-generation (target block bytes per buffer, scoped-VMEM limit override).
# 2 buffers in + 2 buffers out (double-buffered) => 4x block bytes of VMEM.
_GEN_BLOCK_CONFIG = {
    "v7": (8 << 20, 48 << 20),   # ~3.2 TB/s HBM, 64 MiB physical VMEM -> raise limit
    "v6": (6 << 20, 48 << 20),   # ~1.4 TB/s HBM, 128 MiB physical VMEM
    "v5": (3 << 20, None),       # ~0.8 TB/s HBM, 16 MiB scoped default -> stay under
}
_DEFAULT_BLOCK_CONFIG = (2 << 20, None)

# Below this element count the custom-call / pipeline setup dominates; plain XLA
# elementwise fusion is faster.
_MIN_PALLAS_ELEMENTS = 256 * 1024


def _tpu_generation() -> str:
    try:
        kind = jax.devices()[0].device_kind.lower()
    except Exception:
        return "unknown"
    for gen in ("v7", "v6", "v5"):
        if gen in kind:
            return gen
    return "unknown"


def _sublane_multiple(dtype) -> int:
    # Packed-sublane tile heights: 4-byte -> 8, 2-byte -> 16, 1-byte -> 32.
    itemsize = jnp.dtype(dtype).itemsize
    return max(8, 32 // max(itemsize, 1))


def _affine_kernel(w_ref, b_ref, x_ref, o_ref, *, compute_dtype):
    # w_ref, b_ref: (1, 1) scalars in SMEM; x_ref / o_ref: VMEM tiles.
    w = w_ref[0, 0].astype(compute_dtype)
    b = b_ref[0, 0].astype(compute_dtype)
    y = x_ref[...].astype(compute_dtype) * w + b
    o_ref[...] = y.astype(o_ref.dtype)          # store in native (narrow) dtype


def _pick_view(x: jax.Array):
    """Pick a (rows, cols) lane-dense 2-D view of x that is a copy-free reshape."""
    n = max(x.size, 1)
    # 1) Largest 128-multiple divisor of n, capped at _MAX_VIEW_COLS (unmasked
    #    wide vector stores, long contiguous DMA rows).
    cols = min(_MAX_VIEW_COLS, (n // _LANE) * _LANE)
    while cols >= _LANE:
        if n % cols == 0:
            return n // cols, cols
        cols -= _LANE
    # 2) Largest divisor of n in [128, _MAX_VIEW_COLS]: still wide rows; the
    #    block last dim equals the full dim so the shape stays legal w/o padding.
    for cand in range(min(_MAX_VIEW_COLS, n), _LANE - 1, -1):
        if n % cand == 0:
            return n // cand, cand
    # 3) Pathological (tiny or prime-ish n): single row; columns get blocked in
    #    128-aligned chunks (masked tail) by the wrapper if needed.
    return 1, n


def linear_regression_forward(x: jax.Array, weights: jax.Array, bias: jax.Array,
                              *, force_pallas: bool = False) -> jax.Array:
    """Compute weights * x + bias elementwise (scalar weights/bias, shape (1,))."""
    orig_shape = x.shape
    # Float inputs keep their dtype; integer inputs promote to f32 (PyTorch-style).
    out_dtype = x.dtype if jnp.issubdtype(x.dtype, jnp.floating) else jnp.float32
    n = x.size

    gen = _tpu_generation()
    target_bytes, vmem_limit = _GEN_BLOCK_CONFIG.get(gen, _DEFAULT_BLOCK_CONFIG)

    # Tiny inputs: skip the custom call, let XLA fuse (same numerics / dtype policy).
    if not force_pallas and n < _MIN_PALLAS_ELEMENTS:
        w = weights.reshape(()).astype(jnp.float32)
        b = bias.reshape(()).astype(jnp.float32)
        return (w * x.astype(jnp.float32) + b).astype(out_dtype)

    rows, cols = _pick_view(x)
    x2 = x.reshape(rows, cols)  # linear-order preserving -> free in XLA

    in_itemsize = jnp.dtype(x.dtype).itemsize
    out_itemsize = jnp.dtype(out_dtype).itemsize
    sublane = _sublane_multiple(x.dtype)

    # Column blocking (only reachable via the pathological single-row fallback).
    if cols * in_itemsize > target_bytes:
        granule = 8 * _LANE  # 1024-element (8x128) granules -> lane-dense stores
        max_cols = max(granule, ((target_bytes // in_itemsize) // granule) * granule)
        block_cols = max(_LANE, min(max_cols, (cols // _LANE) * _LANE))
    else:
        block_cols = cols

    # Row blocking: biggest block that fits the per-generation budget.
    max_block_rows = max(sublane, target_bytes // max(block_cols * in_itemsize, 1))
    if rows <= max_block_rows:
        block_rows = rows                      # single / full-extent row block
    else:
        aligned = max(sublane, (max_block_rows // sublane) * sublane)
        block_rows = aligned
        # Prefer an exact divisor of rows (no masked edge block / wasted step),
        # without shrinking the block by more than 2x.
        cand = aligned
        while cand >= max(sublane, aligned // 2):
            if rows % cand == 0:
                block_rows = cand
                break
            cand -= sublane

    grid = (pl.cdiv(rows, block_rows), pl.cdiv(cols, block_cols))

    # Grid semantics: shard across the two TensorCores on v7x; plain parallel
    # on single-TC chips (v5e / v6e) where it makes no codegen difference.
    row_sem = pltpu.PARALLEL
    col_sem = pltpu.PARALLEL
    if gen == "v7":
        if grid[0] >= 2:
            row_sem = pltpu.CORE_PARALLEL
        elif grid[1] >= 2:
            col_sem = pltpu.CORE_PARALLEL

    # bf16 math is fine on v6e/v7x VALU; v5e has no bf16 VALU -> upcast to f32.
    compute_dtype = jnp.float32
    if x.dtype == jnp.bfloat16 and gen in ("v6", "v7"):
        compute_dtype = jnp.bfloat16

    w_smem = weights.reshape(1, 1).astype(jnp.float32)
    b_smem = bias.reshape(1, 1).astype(jnp.float32)

    cost = pl.CostEstimate(
        flops=2 * n,
        transcendentals=0,
        bytes_accessed=n * (in_itemsize + out_itemsize) + 8,
    )

    kernel = functools.partial(_affine_kernel, compute_dtype=compute_dtype)

    out2 = pl.pallas_call(
        kernel,
        out_shape=jax.ShapeDtypeStruct((rows, cols), out_dtype),
        grid_spec=pltpu.PrefetchScalarGridSpec(
            num_scalar_prefetch=0,
            grid=grid,
            in_specs=[
                pl.BlockSpec(memory_space=pltpu.SMEM),            # weights (1,1)
                pl.BlockSpec(memory_space=pltpu.SMEM),            # bias (1,1)
                pl.BlockSpec((block_rows, block_cols), lambda i, j: (i, j)),
            ],
            out_specs=pl.BlockSpec((block_rows, block_cols), lambda i, j: (i, j)),
        ),
        compiler_params=pltpu.CompilerParams(
            dimension_semantics=(row_sem, col_sem),
            vmem_limit_bytes=vmem_limit,
        ),
        cost_estimate=cost,
    )(w_smem, b_smem, x2)

    return out2.reshape(orig_shape)


if __name__ == "__main__":
    key = jax.random.PRNGKey(0)
    kw, kb, kx = jax.random.split(key, 3)

    # Deterministic "parameters" matching nn.Parameter(torch.randn(1)) shapes.
    weights = jax.random.normal(kw, (1,), dtype=jnp.float32)
    bias = jax.random.normal(kb, (1,), dtype=jnp.float32)

    # Small regression-style batch; force the Pallas path so the kernel runs.
    x = jax.random.normal(kx, (8, 128), dtype=jnp.float32)
    y = jax.block_until_ready(
        linear_regression_forward(x, weights, bias, force_pallas=True))
    y_ref = weights[0] * x + bias[0]
    assert y.shape == x.shape and y.dtype == x.dtype
    assert jnp.allclose(y, y_ref, atol=1e-6, rtol=1e-6)

    # Non-128-divisible shape (full-extent fallback block, no padding).
    x_odd = jax.random.normal(kx, (5, 7), dtype=jnp.float32)
    y_odd = jax.block_until_ready(
        linear_regression_forward(x_odd, weights, bias, force_pallas=True))
    assert jnp.allclose(y_odd, weights[0] * x_odd + bias[0], atol=1e-6, rtol=1e-6)

    # Auto path (tiny input -> plain XLA fusion) must match kernel numerics.
    y_auto = jax.block_until_ready(linear_regression_forward(x, weights, bias))
    assert jnp.allclose(y_auto, y, atol=1e-6, rtol=1e-6)

    # bf16 input exercises the narrow-dtype store (and bf16 math on v6e/v7x).
    x_bf16 = x.astype(jnp.bfloat16)
    y_bf16 = jax.block_until_ready(
        linear_regression_forward(x_bf16, weights, bias, force_pallas=True))
    assert y_bf16.shape == x_bf16.shape and y_bf16.dtype == jnp.bfloat16
    assert jnp.allclose(y_bf16.astype(jnp.float32),
                        weights[0] * x_bf16.astype(jnp.float32) + bias[0],
                        atol=1e-1, rtol=1e-1)

    print("KERNEL_OK")
</pallas_src>

<mosaic_0001>
module attributes {stable_mosaic.version = 11 : i64} {
  func.func @_affine_kernel(%arg0: i32, %arg1: i32, %arg2: memref<1x1xf32, #tpu.memory_space<smem>>, %arg3: memref<1x1xf32, #tpu.memory_space<smem>>, %arg4: memref<1x1024xf32, #tpu.memory_space<vmem>>, %arg5: memref<1x1024xf32, #tpu.memory_space<vmem>>) attributes {dimension_semantics = [#tpu.dimension_semantics<parallel>, #tpu.dimension_semantics<parallel>], iteration_bounds = array<i64: 1, 1>, scalar_prefetch = 0 : i64, scratch_operands = 0 : i64, tpu.core_type = #tpu.core_type<tc>, window_params = [{transform_indices = @transform_0, window_bounds = array<i64: 1, 1>}, {transform_indices = @transform_1, window_bounds = array<i64: 1, 1>}, {transform_indices = @transform_2, window_bounds = array<i64: 1, 1024>}, {transform_indices = @transform_3, window_bounds = array<i64: 1, 1024>}]} {
    %c0 = arith.constant 0 : index
    %c0_0 = arith.constant 0 : index
    %0 = memref.load %arg2[%c0, %c0_0] : memref<1x1xf32, #tpu.memory_space<smem>>
    %c0_1 = arith.constant 0 : index
    %c0_2 = arith.constant 0 : index
    %1 = memref.load %arg3[%c0_1, %c0_2] : memref<1x1xf32, #tpu.memory_space<smem>>
    %c0_3 = arith.constant 0 : index
    %c0_4 = arith.constant 0 : index
    %2 = vector.load %arg4[%c0_3, %c0_4] : memref<1x1024xf32, #tpu.memory_space<vmem>>, vector<1x1024xf32>
    %3 = vector.broadcast %0 : f32 to vector<1x1024xf32>
    %4 = arith.mulf %2, %3 : vector<1x1024xf32>
    %5 = vector.broadcast %1 : f32 to vector<1x1024xf32>
    %6 = arith.addf %4, %5 : vector<1x1024xf32>
    %c0_5 = arith.constant 0 : index
    %c0_6 = arith.constant 0 : index
    %7 = vector.load %arg5[%c0_5, %c0_6] : memref<1x1024xf32, #tpu.memory_space<vmem>>, vector<1x1024xf32>
    tpu.vector_store %arg5[%c0_5, %c0_6], %6 {strides = array<i32>} : memref<1x1024xf32, #tpu.memory_space<vmem>>, vector<1x1024xf32>,
    return
  }
  func.func @transform_0(%arg0: i32, %arg1: i32) -> (i32, i32) {
    %c0_i32 = arith.constant 0 : i32
    %c0_i32_0 = arith.constant 0 : i32
    %c0_i32_1 = arith.constant 0 : i32
    return %c0_i32, %c0_i32_0 : i32, i32
  }
  func.func @transform_1(%arg0: i32, %arg1: i32) -> (i32, i32) {
    %c0_i32 = arith.constant 0 : i32
    %c0_i32_0 = arith.constant 0 : i32
    %c0_i32_1 = arith.constant 0 : i32
    return %c0_i32, %c0_i32_0 : i32, i32
  }
  func.func @transform_2(%arg0: i32, %arg1: i32) -> (i32, i32) {
    %c0_i32 = arith.constant 0 : i32
    return %arg0, %arg1 : i32, i32
  }
  func.func @transform_3(%arg0: i32, %arg1: i32) -> (i32, i32) {
    %c0_i32 = arith.constant 0 : i32
    return %arg0, %arg1 : i32, i32
  }
}

</mosaic_0001>

<bundles_post_ra>
// kernel: tpu_custom_call.1
= control target key start
LH: loop header
LB: loop body
LE: loop exit
PB: predicated region body
PF: predicated region fallthrough
CT: control target
= control target key end

     0   :  { %10 = vsyncpa [#allocation5], 0  ;;  %s144_s0 = inlined_call_operand.<no memory space> [shape: f32[1,1], index: 0, kind: input, shape index: {}]   ;;  %s145_s1 = inlined_call_operand.<no memory space> [shape: f32[1,1], index: 1, kind: input, shape index: {}]   ;;  %s146_s2 = inlined_call_operand.hbm [shape: f32[1,1024], index: 2, kind: input, shape index: {}]   ;;  %s147_s3 = inlined_call_operand.hbm [shape: f32[1,1024], index: 3, kind: output, shape index: {}]  }
   0x1   :  { %11 = vsyncpa [#allocation6], 0  ;;  %s21_s14 = sshll.u32 %s146_s2, 4  ;;  %s110_s15 = smov [#allocation4]   ;;  %s22_s14 = int_to_ptr.hbm [resolvable:$true] %s21_s14 }
   0x2   :  { %s23_s16 = sshll.u32 %s110_s15, 4  ;;  %s24_s16 = int_to_ptr.vmem [resolvable:$true] %s23_s16 }
   0x3   :  { %26 = dma.hbm_to_vmem [thread:$0]  %s22_s14, 128, %s24_s16, [#allocation5]  }
   0x4   :  { %106 = dma.done.wait [#allocation5], 128  }
   0x5   :  { %107 = vsyncadd [#allocation5], 4294967168  ;;  %v34_v0 = vstv %s144_s0  ;;  %v33_v1 = vld [vmem:[#allocation4] sm:$0xff]  ;;  %v36_v2 = vstv %s145_s1  ;;  %s111_s21 = smov [#allocation7]   ;;  %s46_s24 = sshll.u32 %s147_s3, 4  ;;  %s47_s24 = int_to_ptr.hbm [resolvable:$true] %s46_s24 }
   0x6   :  { %s44_s22 = sshll.u32 %s111_s21, 4  ;;  %v35_v3 = vmul.f32 %v34_v0, %v33_v1  ;;  %s45_s22 = int_to_ptr.vmem [resolvable:$true] %s44_s22 }
   0x8   :  { %v37_v4 = vadd.f32 %v36_v2, %v35_v3 }
   0xa   :  { %38 = vst [vmem:[#allocation7] sm:$0xff] %v37_v4 }
   0xb   :  { %49 = dma.vmem_to_hbm [thread:$0]  %s45_s22, 128, %s47_s24, [#allocation6]  }
   0xc   :  { %108 = dma.done.wait [#allocation6], 128  }
   0xd   :  { %109 = vsyncadd [#allocation6], 4294967168 }
   0xe   :  { %54 = vsyncpa [#allocation5], 1 }
   0xf   :  { %55 = vsyncpa [#allocation6], 1 }

</bundles_post_ra>
